<compile_context>
chip_gen: v6e
topology: v6e:2x2x1
jax: 0.10.0
libtpu: 0.0.40
codegen_flags: <defaults>
</compile_context>

<pallas_src>
import jax
import jax.numpy as jnp
import numpy as np
from jax.experimental import pallas as pl
from jax.experimental.pallas import tpu as pltpu

LANE = 128     # TPU vreg lane width
SUBLANE = 8    # TPU vreg sublane width


def _round_up(n, m):
    return ((n + m - 1) // m) * m


# ----------------------------------------------------------------------------
# Pallas kernel: fused 3-layer MLP (Linear -> ReLU -> Linear -> ReLU -> Linear)
# Weights/biases are resident; one grid step processes a (TB, d_in) batch tile
# and stores a lane-narrow (TB, Q) result directly (no post-kernel slice).
# ----------------------------------------------------------------------------
def _mlp_kernel(x_ref, w1_ref, w2_ref, w3_ref, bias_ref, o_ref):
    w_dtype = w1_ref.dtype          # f32 by default, bf16 if requested
    nq = o_ref.shape[-1]            # static: number of quantiles

    b1 = bias_ref[0:1, :]           # (1, H_P) f32
    b2 = bias_ref[1:2, :]           # (1, H_P) f32
    b3 = bias_ref[2:3, :][:, :nq]   # (1, Q)  f32

    # Layer 1: (TB, d_in) @ (d_in, H_P) + bias, ReLU.  Accumulate in f32.
    h1 = jnp.dot(x_ref[...].astype(w_dtype), w1_ref[...],
                 preferred_element_type=jnp.float32)
    h1 = jnp.maximum(h1 + b1, 0.0)  # f32 elementwise (v5e-safe)
    # TODO(synk): nn.Dropout is identity in eval mode; training-mode dropout
    # (pltpu.prng_seed + pltpu.stateful_bernoulli) is not implemented.

    # Layer 2: (TB, H_P) @ (H_P, H_P) + bias, ReLU.
    h2 = jnp.dot(h1.astype(w_dtype), w2_ref[...],
                 preferred_element_type=jnp.float32)
    h2 = jnp.maximum(h2 + b2, 0.0)

    # Layer 3: (TB, H_P) @ (H_P, Q) + bias.  Narrow (Q-wide) store; at scale
    # the saved HBM writeback dwarfs the masked-vst cost.
    out = jnp.dot(h2.astype(w_dtype), w3_ref[...],
                  preferred_element_type=jnp.float32)
    o_ref[...] = (out + b3).astype(o_ref.dtype)


# ----------------------------------------------------------------------------
# Wrapper: balanced batch grid, resident weights, minimal padding.
# ----------------------------------------------------------------------------
def all_q_model_forward(x, padded_params, *, batch_tile=1024):
    """Run the fused MLP forward pass.

    x             : (B, in_shape) float32
    padded_params : dict of arrays from pad_params()
    """
    w1 = padded_params["w1"]      # (d_in, H_P)
    w2 = padded_params["w2"]      # (H_P, H_P)
    w3 = padded_params["w3"]      # (H_P, Q)
    bias = padded_params["bias"]  # (8, H_P) f32, rows = [b1, b2, b3, 0...]

    B, d_in = x.shape
    assert d_in == w1.shape[0], "input feature dim mismatch"
    H_P = w1.shape[1]
    nq = w3.shape[1]

    # Balanced batch tiling: cap padded-row waste at <8 rows per tile, and use
    # >=2 grid steps when B allows so both v7x TensorCores get work (harmless
    # on the single-TC v5e/v6e: one extra ~0.35us grid step).
    num_tiles = pl.cdiv(B, batch_tile)
    if B >= 2 * SUBLANE:
        num_tiles = max(num_tiles, 2)
    TB = _round_up(pl.cdiv(B, num_tiles), SUBLANE)
    B_pad = _round_up(B, TB)
    grid = (B_pad // TB,)

    # Pad rows only (and only when needed); padded junk rows are sliced off.
    x_in = x if B_pad == B else jnp.pad(x, ((0, B_pad - B), (0, 0)))

    out = pl.pallas_call(
        _mlp_kernel,
        out_shape=jax.ShapeDtypeStruct((B_pad, nq), jnp.float32),
        grid_spec=pltpu.PrefetchScalarGridSpec(
            num_scalar_prefetch=0,
            grid=grid,
            in_specs=[
                # x: tiled over the batch axis; last dim == full array dim.
                pl.BlockSpec((TB, d_in), lambda i: (i, 0)),
                # weights / packed biases: resident (constant index_map ->
                # DMA'd once, not per grid step).
                pl.BlockSpec((d_in, H_P), lambda i: (0, 0)),
                pl.BlockSpec((H_P, H_P), lambda i: (0, 0)),
                pl.BlockSpec((H_P, nq), lambda i: (0, 0)),
                pl.BlockSpec((SUBLANE, H_P), lambda i: (0, 0)),
            ],
            out_specs=pl.BlockSpec((TB, nq), lambda i: (i, 0)),
        ),
        compiler_params=pltpu.CompilerParams(
            # Batch axis is embarrassingly parallel.
            dimension_semantics=("parallel",),
        ),
    )(x_in, w1, w2, w3, bias)

    return out if B_pad == B else out[:B]


# ----------------------------------------------------------------------------
# Deterministic parameter init (mimics nn.init.orthogonal_ + zero bias)
# ----------------------------------------------------------------------------
def _orthogonal(key, rows, cols, dtype=jnp.float32):
    """PyTorch-style orthogonal init for a weight of shape (rows, cols)."""
    transpose = rows < cols
    r, c = (cols, rows) if transpose else (rows, cols)
    a = jax.random.normal(key, (r, c), dtype=jnp.float32)
    q, rmat = jnp.linalg.qr(a)
    d = jnp.sign(jnp.diagonal(rmat))  # sign correction (as torch does)
    q = q * d[None, :]
    w = q.T if transpose else q
    return w.astype(dtype)  # shape (rows, cols)


def make_params(key, in_shape, hidden_size, num_quantiles):
    """Unpadded parameters, stored pre-transposed as (in, out)."""
    k1, k2, k3 = jax.random.split(key, 3)
    # PyTorch Linear weight is (out, in); we store the transpose (in, out).
    w1_t = _orthogonal(k1, hidden_size, in_shape)        # (H, in)
    w2_t = _orthogonal(k2, hidden_size, hidden_size)     # (H, H)
    w3_t = _orthogonal(k3, num_quantiles, hidden_size)   # (Q, H)
    return {
        "w1": w1_t.T, "b1": jnp.zeros((hidden_size,), jnp.float32),
        "w2": w2_t.T, "b2": jnp.zeros((hidden_size,), jnp.float32),
        "w3": w3_t.T, "b3": jnp.zeros((num_quantiles,), jnp.float32),
    }


def pad_params(params, weight_dtype=jnp.float32):
    """Prepare kernel operands.

    * Hidden dim is zero-padded to the 128-lane width (exact for matmul +
      zero bias + ReLU).  Input dim and quantile dim are NOT padded.
    * The three biases are packed into one (8, H_P) f32 array (rows 0/1/2).
    * Weights may be cast to bf16 for MXU throughput; biases / elementwise
      math stay f32 (v5e has no bf16 VPU/EUP).
    """
    d_in, H = params["w1"].shape
    Q = params["w3"].shape[1]
    H_P = _round_up(H, LANE)

    def pad2(a, r, c, dtype):
        out = jnp.zeros((r, c), dtype)
        return out.at[:a.shape[0], :a.shape[1]].set(a.astype(dtype))

    bias = jnp.zeros((SUBLANE, H_P), jnp.float32)
    bias = bias.at[0, :H].set(params["b1"])
    bias = bias.at[1, :H].set(params["b2"])
    bias = bias.at[2, :Q].set(params["b3"])

    return {
        "w1": pad2(params["w1"], d_in, H_P, weight_dtype),  # (d_in, H_P)
        "w2": pad2(params["w2"], H_P, H_P, weight_dtype),   # (H_P, H_P)
        "w3": pad2(params["w3"], H_P, Q, weight_dtype),     # (H_P, Q)
        "bias": bias,                                       # (8, H_P) f32
    }


# ----------------------------------------------------------------------------
# Pure-JAX reference for correctness (unpadded weights)
# ----------------------------------------------------------------------------
def reference_forward(x, p):
    h = jnp.maximum(x @ p["w1"] + p["b1"][None, :], 0.0)
    h = jnp.maximum(h @ p["w2"] + p["b2"][None, :], 0.0)
    return h @ p["w3"] + p["b3"][None, :]


if __name__ == "__main__":
    batch = 8
    in_shape = 16
    hidden_size = 64
    quantiles = np.array([0.05, 0.25, 0.5, 0.75, 0.95])
    num_quantiles = len(quantiles)

    key = jax.random.PRNGKey(0)
    kx, kp = jax.random.split(key)
    x = jax.random.normal(kx, (batch, in_shape), dtype=jnp.float32)

    raw_params = make_params(kp, in_shape, hidden_size, num_quantiles)
    ref = reference_forward(x, raw_params)

    # f32 path: numerically exact vs. reference.
    params_f32 = pad_params(raw_params, weight_dtype=jnp.float32)
    out = jax.block_until_ready(all_q_model_forward(x, params_f32))
    np.testing.assert_allclose(np.asarray(out), np.asarray(ref),
                               rtol=1e-5, atol=1e-5)
    assert out.shape == (batch, num_quantiles)

    # bf16 MXU-operand path (recommended at scale on v5e/v6e/v7x): loose check.
    params_bf16 = pad_params(raw_params, weight_dtype=jnp.bfloat16)
    out_bf16 = jax.block_until_ready(all_q_model_forward(x, params_bf16))
    np.testing.assert_allclose(np.asarray(out_bf16), np.asarray(ref),
                               rtol=1e-1, atol=1e-1)
    assert out_bf16.shape == (batch, num_quantiles)

    print("KERNEL_OK")
</pallas_src>

<mosaic_0001>
module attributes {stable_mosaic.version = 11 : i64} {
  func.func @_mlp_kernel(%arg0: i32, %arg1: memref<8x16xf32, #tpu.memory_space<vmem>>, %arg2: memref<16x128xf32, #tpu.memory_space<vmem>>, %arg3: memref<128x128xf32, #tpu.memory_space<vmem>>, %arg4: memref<128x5xf32, #tpu.memory_space<vmem>>, %arg5: memref<8x128xf32, #tpu.memory_space<vmem>>, %arg6: memref<8x5xf32, #tpu.memory_space<vmem>>) attributes {dimension_semantics = [#tpu.dimension_semantics<parallel>], iteration_bounds = array<i64: 1>, scalar_prefetch = 0 : i64, scratch_operands = 0 : i64, tpu.core_type = #tpu.core_type<tc>, window_params = [{transform_indices = @transform_0, window_bounds = array<i64: 8, 16>}, {pipeline_mode = #tpu.pipeline_mode<synchronous>, transform_indices = @transform_1, window_bounds = array<i64: 16, 128>}, {pipeline_mode = #tpu.pipeline_mode<synchronous>, transform_indices = @transform_2, window_bounds = array<i64: 128, 128>}, {pipeline_mode = #tpu.pipeline_mode<synchronous>, transform_indices = @transform_3, window_bounds = array<i64: 128, 5>}, {pipeline_mode = #tpu.pipeline_mode<synchronous>, transform_indices = @transform_4, window_bounds = array<i64: 8, 128>}, {transform_indices = @transform_5, window_bounds = array<i64: 8, 5>}]} {
    %c0 = arith.constant 0 : index
    %c0_0 = arith.constant 0 : index
    %0 = vector.load %arg5[%c0, %c0_0] : memref<8x128xf32, #tpu.memory_space<vmem>>, vector<1x128xf32>
    %c1 = arith.constant 1 : index
    %c0_1 = arith.constant 0 : index
    %1 = vector.load %arg5[%c1, %c0_1] : memref<8x128xf32, #tpu.memory_space<vmem>>, vector<1x128xf32>
    %c2 = arith.constant 2 : index
    %c0_2 = arith.constant 0 : index
    %2 = vector.load %arg5[%c2, %c0_2] : memref<8x128xf32, #tpu.memory_space<vmem>>, vector<1x128xf32>
    %3 = vector.extract_strided_slice %2 {offsets = [0, 0], sizes = [1, 5], strides = [1, 1]} : vector<1x128xf32> to vector<1x5xf32>
    %c0_3 = arith.constant 0 : index
    %c0_4 = arith.constant 0 : index
    %4 = vector.load %arg1[%c0_3, %c0_4] : memref<8x16xf32, #tpu.memory_space<vmem>>, vector<8x16xf32>
    %c0_5 = arith.constant 0 : index
    %c0_6 = arith.constant 0 : index
    %5 = vector.load %arg2[%c0_5, %c0_6] : memref<16x128xf32, #tpu.memory_space<vmem>>, vector<16x128xf32>
    %cst = arith.constant dense<0.000000e+00> : vector<8x128xf32>
    %6 = tpu.matmul %4, %5, %cst {dimension_numbers = #tpu.dot_dimension_numbers<[1], [0], [0], [1], [0, 0, 1, 1], [], []>} : vector<8x16xf32>, vector<16x128xf32>, vector<8x128xf32> -> vector<8x128xf32>
    %7 = vector.broadcast %0 : vector<1x128xf32> to vector<8x128xf32>
    %8 = arith.addf %6, %7 : vector<8x128xf32>
    %cst_7 = arith.constant 0.000000e+00 : f32
    %9 = vector.broadcast %cst_7 : f32 to vector<8x128xf32>
    %10 = arith.maximumf %8, %9 : vector<8x128xf32>
    %c0_8 = arith.constant 0 : index
    %c0_9 = arith.constant 0 : index
    %11 = vector.load %arg3[%c0_8, %c0_9] : memref<128x128xf32, #tpu.memory_space<vmem>>, vector<128x128xf32>
    %cst_10 = arith.constant dense<0.000000e+00> : vector<8x128xf32>
    %12 = tpu.matmul %10, %11, %cst_10 {dimension_numbers = #tpu.dot_dimension_numbers<[1], [0], [0], [1], [0, 0, 1, 1], [], []>} : vector<8x128xf32>, vector<128x128xf32>, vector<8x128xf32> -> vector<8x128xf32>
    %13 = vector.broadcast %1 : vector<1x128xf32> to vector<8x128xf32>
    %14 = arith.addf %12, %13 : vector<8x128xf32>
    %cst_11 = arith.constant 0.000000e+00 : f32
    %15 = vector.broadcast %cst_11 : f32 to vector<8x128xf32>
    %16 = arith.maximumf %14, %15 : vector<8x128xf32>
    %c0_12 = arith.constant 0 : index
    %c0_13 = arith.constant 0 : index
    %17 = vector.load %arg4[%c0_12, %c0_13] : memref<128x5xf32, #tpu.memory_space<vmem>>, vector<128x5xf32>
    %cst_14 = arith.constant dense<0.000000e+00> : vector<8x5xf32>
    %18 = tpu.matmul %16, %17, %cst_14 {dimension_numbers = #tpu.dot_dimension_numbers<[1], [0], [0], [1], [0, 0, 1, 1], [], []>} : vector<8x128xf32>, vector<128x5xf32>, vector<8x5xf32> -> vector<8x5xf32>
    %19 = vector.broadcast %3 : vector<1x5xf32> to vector<8x5xf32>
    %20 = arith.addf %18, %19 : vector<8x5xf32>
    %c0_15 = arith.constant 0 : index
    %c0_16 = arith.constant 0 : index
    %21 = vector.load %arg6[%c0_15, %c0_16] : memref<8x5xf32, #tpu.memory_space<vmem>>, vector<8x5xf32>
    tpu.vector_store %arg6[%c0_15, %c0_16], %20 {strides = array<i32>} : memref<8x5xf32, #tpu.memory_space<vmem>>, vector<8x5xf32>,
    return
  }
  func.func @transform_0(%arg0: i32) -> (i32, i32) {
    %c0_i32 = arith.constant 0 : i32
    %c0_i32_0 = arith.constant 0 : i32
    return %arg0, %c0_i32 : i32, i32
  }
  func.func @transform_1(%arg0: i32) -> (i32, i32) {
    %c0_i32 = arith.constant 0 : i32
    %c0_i32_0 = arith.constant 0 : i32
    %c0_i32_1 = arith.constant 0 : i32
    return %c0_i32, %c0_i32_0 : i32, i32
  }
  func.func @transform_2(%arg0: i32) -> (i32, i32) {
    %c0_i32 = arith.constant 0 : i32
    %c0_i32_0 = arith.constant 0 : i32
    %c0_i32_1 = arith.constant 0 : i32
    return %c0_i32, %c0_i32_0 : i32, i32
  }
  func.func @transform_3(%arg0: i32) -> (i32, i32) {
    %c0_i32 = arith.constant 0 : i32
    %c0_i32_0 = arith.constant 0 : i32
    %c0_i32_1 = arith.constant 0 : i32
    return %c0_i32, %c0_i32_0 : i32, i32
  }
  func.func @transform_4(%arg0: i32) -> (i32, i32) {
    %c0_i32 = arith.constant 0 : i32
    %c0_i32_0 = arith.constant 0 : i32
    %c0_i32_1 = arith.constant 0 : i32
    return %c0_i32, %c0_i32_0 : i32, i32
  }
  func.func @transform_5(%arg0: i32) -> (i32, i32) {
    %c0_i32 = arith.constant 0 : i32
    %c0_i32_0 = arith.constant 0 : i32
    return %arg0, %c0_i32 : i32, i32
  }
}

</mosaic_0001>

<bundles_post_ra>
// kernel: tpu_custom_call.1
= control target key start
LH: loop header
LB: loop body
LE: loop exit
PB: predicated region body
PF: predicated region fallthrough
CT: control target
= control target key end

     0   :  { %10 = vsyncpa [#allocation3], 0  ;;  %s707_s0 = inlined_call_operand.vmem [shape: f32[8,16], index: 0, kind: input, shape index: {}]   ;;  %s708_s1 = inlined_call_operand.hbm [shape: f32[16,128], index: 1, kind: input, shape index: {}]   ;;  %s709_s2 = inlined_call_operand.vmem [shape: f32[128,128], index: 2, kind: input, shape index: {}]   ;;  %s710_s3 = inlined_call_operand.vmem [shape: f32[128,5], index: 3, kind: input, shape index: {}]   ;;  %s711_s4 = inlined_call_operand.hbm [shape: f32[8,128], index: 4, kind: input, shape index: {}]   ;;  %s712_s5 = inlined_call_operand.hbm [shape: f32[8,5], index: 5, kind: output, shape index: {}]  }
   0x1   :  { %11 = vsyncpa [#allocation6], 0 }
   0x2   :  { %12 = vsyncpa [#allocation4], 0  ;;  %s522_s18 = smov [#allocation2]  }
   0x3   :  { %s20_s19 = sshll.u32 %s522_s18, 4  ;;  %s21_s19 = int_to_ptr.vmem [resolvable:$true] %s20_s19 }
   0x4   :  { %s464_s20 = scalar_lea.vmem %s21_s19, 256  ;;  %p469_p1 = scmp.lt.s32.totalorder %s21_s19, %s21_s19 }
   0x5   :  { %p465_p0 = scmp.ne.s32.totalorder %s21_s19, %s464_s20  ;;  %p470_p2 = scmp.lt.s32.totalorder %s464_s20, %s464_s20 }
   0x7   :  { %p471_p3 = por %p470_p2, %p469_p1 }
   0x9   :  { %p472_p4 = pnand %p471_p3, %p465_p0 }
   0xb   :  { %475 = shalt.err (!%p472_p4)
}
   0xc   :  { %s523_s21 = smov 128   ;;  %s524_s22 = smov 8  }
   0xd   :  { %26 = dma.hbm_to_vmem [thread:$0]  %s708_s1, 256, %s21_s19, [#allocation3], %s523_s21, %s523_s21, %s524_s22  }
   0xe   :  { %s525_s25 = smov [#allocation5]  }
   0xf   :  { %s37_s26 = sshll.u32 %s525_s25, 4  ;;  %s38_s26 = int_to_ptr.vmem [resolvable:$true] %s37_s26 }
  0x10   :  { %s484_s27 = scalar_lea.vmem %s38_s26, 128  ;;  %p489_p6 = scmp.lt.s32.totalorder %s38_s26, %s38_s26 }
  0x11   :  { %p485_p5 = scmp.ne.s32.totalorder %s38_s26, %s484_s27  ;;  %p490_p7 = scmp.lt.s32.totalorder %s484_s27, %s484_s27 }
  0x13   :  { %p491_p8 = por %p490_p7, %p489_p6 }
  0x15   :  { %p492_p9 = pnand %p491_p8, %p485_p5 }
  0x17   :  { %495 = shalt.err (!%p492_p9)
}
  0x18   :  { %40 = dma.hbm_to_vmem [thread:$0]  %s711_s4, 128, %s38_s26, [#allocation6]  }
  0x19   :  { %516 = dma.done.wait [#allocation3], 256  }
  0x1a   :  { %517 = vsyncadd [#allocation3], 4294967040 }
  0x1b   :  { %518 = dma.done.wait [#allocation6], 128  }
  0x1c   :  { %519 = vsyncadd [#allocation6], 4294967168  ;;  %v526_v0 = vmov 0.0   ;;  %vm527_vm0 = vmmov 0   ;;  %v52_v1 = vld [vmem:[#allocation2 + $0x8] sm:$0xff]  ;;  %v51_v2 = vld [vmem:[#allocation2] sm:$0xff] }
  0x1d   :  { %372 = vmatprep.subr.mxu0 %v526_v0  ;;  %376 = vmatprep.mubr.msk.f32.mxu0 %vm527_vm0, %v526_v0  ;;  %v50_v3 = vld [vmem:[%s707_s0] sm:$0xff]  ;;  %vm57_vm1 = vcmask 130048   ;;  %v147_v4 = vld [vmem:[%s709_s2 + $0x78] sm:$0xff]  ;;  %v146_v5 = vld [vmem:[%s709_s2 + $0x70] sm:$0xff]  ;;  %s528_s11 = smov [#allocation7]   ;;  %vm313_vm2 = vcmask 39936  }
  0x1e   :  { %379 = vmatprep.subr.mxu1 %v526_v0  ;;  %411 = vmatprep.mubr.msk.f32.mxu1 %vm527_vm0, %v526_v0  ;;  %v145_v6 = vld [vmem:[%s709_s2 + $0x68] sm:$0xff]  ;;  %v144_v7 = vld [vmem:[%s709_s2 + $0x60] sm:$0xff]  ;;  %v143_v8 = vld [vmem:[%s709_s2 + $0x58] sm:$0xff]  ;;  %s321_s12 = sshll.u32 %s528_s11, 4  ;;  %s322_s12 = int_to_ptr.vmem [resolvable:$true] %s321_s12 }
  0x1f   :  { %373 = vmatpush3.msra.mxu0 %v52_v1  ;;  %380 = vmatpush3.msra.mxu1 %v147_v4  ;;  %v142_v9 = vld [vmem:[%s709_s2 + $0x50] sm:$0xff]  ;;  %v141_v10 = vld [vmem:[%s709_s2 + $0x48] sm:$0xff]  ;;  %v140_v11 = vld [vmem:[%s709_s2 + $0x40] sm:$0xff]  ;;  %s496_s13 = scalar_lea.vmem %s322_s12, 128  ;;  %p501_p11 = scmp.lt.s32.totalorder %s322_s12, %s322_s12 }
  0x20   :  { %374 = vmatprep.subr.mxu0 %v526_v0  ;;  %381 = vmatprep.subr.mxu1 %v526_v0  ;;  %v139_v12 = vld [vmem:[%s709_s2 + $0x38] sm:$0xff]  ;;  %v138_v13 = vld [vmem:[%s709_s2 + $0x30] sm:$0xff]  ;;  %v137_v14 = vld [vmem:[%s709_s2 + $0x28] sm:$0xff]  ;;  %p497_p10 = scmp.ne.s32.totalorder %s322_s12, %s496_s13  ;;  %p502_p12 = scmp.lt.s32.totalorder %s496_s13, %s496_s13 }
  0x21   :  { %375 = vmatpush3.msra.mxu0 %v51_v2  ;;  %382 = vmatpush3.msra.mxu1 %v146_v5  ;;  %v136_v15 = vld [vmem:[%s709_s2 + $0x20] sm:$0xff]  ;;  %v135_v16 = vld [vmem:[%s709_s2 + $0x18] sm:$0xff]  ;;  %v134_v17 = vld [vmem:[%s709_s2 + $0x10] sm:$0xff] }
  0x22   :  { %377 = vmatmul.mubr.msk.f32.vlgmr.msra.gmra.mxu0 %vm57_vm1, %v50_v3  ;;  %383 = vmatprep.subr.mxu1 %v526_v0  ;;  %v133_v18 = vld [vmem:[%s709_s2 + $0x8] sm:$0xff]  ;;  %v132_v19 = vld [vmem:[%s709_s2] sm:$0xff]  ;;  %v238_v20 = vld [vmem:[%s710_s3 + $0x78] sm:$0xff]  ;;  %p503_p13 = por %p502_p12, %p501_p11 }
  0x23   :  { %414 = vmatprep.subr.mxu0 %v526_v0  ;;  %384 = vmatpush3.msra.mxu1 %v145_v6  ;;  %v237_v21 = vld [vmem:[%s710_s3 + $0x70] sm:$0xff]  ;;  %v236_v22 = vld [vmem:[%s710_s3 + $0x68] sm:$0xff]  ;;  %v235_v23 = vld [vmem:[%s710_s3 + $0x60] sm:$0xff] }
  0x24   :  { %446 = vmatprep.mubr.msk.f32.mxu0 %vm527_vm0, %v526_v0  ;;  %385 = vmatprep.subr.mxu1 %v526_v0  ;;  %v234_v24 = vld [vmem:[%s710_s3 + $0x58] sm:$0xff]  ;;  %v233_v25 = vld [vmem:[%s710_s3 + $0x50] sm:$0xff]  ;;  %v232_v26 = vld [vmem:[%s710_s3 + $0x48] sm:$0xff]  ;;  %p504_p0 = pnand %p503_p13, %p497_p10 }
  0x25   :  { %386 = vmatpush3.msra.mxu1 %v144_v7  ;;  %415 = vmatpush3.msra.mxu0 %v238_v20  ;;  %v231_v27 = vld [vmem:[%s710_s3 + $0x40] sm:$0xff]  ;;  %v230_v28 = vld [vmem:[%s710_s3 + $0x38] sm:$0xff]  ;;  %v229_v29 = vld [vmem:[%s710_s3 + $0x30] sm:$0xff] }
  0x26   :  { %387 = vmatprep.subr.mxu1 %v526_v0  ;;  %416 = vmatprep.subr.mxu0 %v526_v0  ;;  %v228_v30 = vld [vmem:[%s710_s3 + $0x28] sm:$0xff]  ;;  %v227_v31 = vld [vmem:[%s710_s3 + $0x20] sm:$0xff]  ;;  %v226_v32 = vld [vmem:[%s710_s3 + $0x18] sm:$0xff] }
  0x27   :  { %388 = vmatpush3.msra.mxu1 %v143_v8  ;;  %417 = vmatpush3.msra.mxu0 %v237_v21  ;;  %v331_v33 = vld [vmem:[#allocation5] ss:$0 sm:$0xff]  ;;  %v224_v39 = vld [vmem:[%s710_s3 + $0x8] sm:$0xff]  ;;  %v223_v40 = vld [vmem:[%s710_s3] sm:$0xff] }
  0x28   :  { %389 = vmatprep.subr.mxu1 %v526_v0  ;;  %418 = vmatprep.subr.mxu0 %v526_v0  ;;  %v225_v38 = vld [vmem:[%s710_s3 + $0x10] sm:$0xff] }
  0x29   :  { %390 = vmatpush3.msra.mxu1 %v142_v9  ;;  %419 = vmatpush3.msra.mxu0 %v236_v22  ;;  %v333_v41 = vld [vmem:[#allocation5 + $0x1] ss:$0 sm:$0xff]  ;;  %v334_v46 = vld [vmem:[#allocation5 + $0x2] ss:$0 sm:$0xff] }
  0x2a   :  { %391 = vmatprep.subr.mxu1 %v526_v0  ;;  %420 = vmatprep.subr.mxu0 %v526_v0 }
  0x2b   :  { %392 = vmatpush3.msra.mxu1 %v141_v10  ;;  %421 = vmatpush3.msra.mxu0 %v235_v23 }
  0x2c   :  { %393 = vmatprep.subr.mxu1 %v526_v0  ;;  %422 = vmatprep.subr.mxu0 %v526_v0 }
  0x2d   :  { %394 = vmatpush3.msra.mxu1 %v140_v11  ;;  %423 = vmatpush3.msra.mxu0 %v234_v24 }
  0x2e   :  { %395 = vmatprep.subr.mxu1 %v526_v0  ;;  %424 = vmatprep.subr.mxu0 %v526_v0 }
  0x2f   :  { %396 = vmatpush3.msra.mxu1 %v139_v12  ;;  %425 = vmatpush3.msra.mxu0 %v233_v25 }
  0x30   :  { %397 = vmatprep.subr.mxu1 %v526_v0  ;;  %426 = vmatprep.subr.mxu0 %v526_v0 }
  0x31   :  { %398 = vmatpush3.msra.mxu1 %v138_v13  ;;  %427 = vmatpush3.msra.mxu0 %v232_v26 }
  0x32   :  { %399 = vmatprep.subr.mxu1 %v526_v0  ;;  %428 = vmatprep.subr.mxu0 %v526_v0 }
  0x33   :  { %400 = vmatpush3.msra.mxu1 %v137_v14  ;;  %429 = vmatpush3.msra.mxu0 %v231_v27 }
  0x34   :  { %401 = vmatprep.subr.mxu1 %v526_v0  ;;  %430 = vmatprep.subr.mxu0 %v526_v0 }
  0x35   :  { %402 = vmatpush3.msra.mxu1 %v136_v15  ;;  %431 = vmatpush3.msra.mxu0 %v230_v28 }
  0x36   :  { %403 = vmatprep.subr.mxu1 %v526_v0  ;;  %432 = vmatprep.subr.mxu0 %v526_v0 }
  0x37   :  { %404 = vmatpush3.msra.mxu1 %v135_v16  ;;  %433 = vmatpush3.msra.mxu0 %v229_v29 }
  0x38   :  { %405 = vmatprep.subr.mxu1 %v526_v0  ;;  %434 = vmatprep.subr.mxu0 %v526_v0 }
  0x39   :  { %406 = vmatpush3.msra.mxu1 %v134_v17  ;;  %435 = vmatpush3.msra.mxu0 %v228_v30 }
  0x3a   :  { %407 = vmatprep.subr.mxu1 %v526_v0  ;;  %436 = vmatprep.subr.mxu0 %v526_v0 }
  0x3b   :  { %408 = vmatpush3.msra.mxu1 %v133_v18  ;;  %437 = vmatpush3.msra.mxu0 %v227_v31 }
  0x3c   :  { %409 = vmatprep.subr.mxu1 %v526_v0  ;;  %438 = vmatprep.subr.mxu0 %v526_v0 }
  0x3d   :  { %410 = vmatpush3.msra.mxu1 %v132_v19  ;;  %439 = vmatpush3.msra.mxu0 %v226_v32 }
  0x3e   :  { %440 = vmatprep.subr.mxu0 %v526_v0 }
  0x3f   :  { %441 = vmatpush3.msra.mxu0 %v225_v38 }
  0x40   :  { %442 = vmatprep.subr.mxu0 %v526_v0 }
  0x41   :  { %443 = vmatpush3.msra.mxu0 %v224_v39 }
  0x42   :  { %444 = vmatprep.subr.mxu0 %v526_v0 }
  0x43   :  { %445 = vmatpush3.msra.mxu0 %v223_v40 }
  0xe2   :  { %v127_v34 = vpop.f32.mrf.mxu0 }
  0xe3   :  { %v128_v35 = vadd.f32 %v331_v33, %v127_v34 }
  0xe4   :  { %v378_v36 = vpop.f32.mrf.mxu0 }
  0xe5   :  { %v131_v37 = vmax.f32 %v128_v35, 0.0 }
  0xe7   :  { %412 = vmatmul.mubr.f32.vlgmr.msra.gmra.mxu1 %v131_v37 }
 0x1a7   :  { %v218_v42 = vpop.f32.mrf.mxu1 }
 0x1a8   :  { %v219_v43 = vadd.f32 %v333_v41, %v218_v42 }
 0x1a9   :  { %v413_v44 = vpop.f32.mrf.mxu1 }
 0x1aa   :  { %v222_v45 = vmax.f32 %v219_v43, 0.0 }
 0x1ac   :  { %447 = vmatmul.mubr.f32.vlgmr.msra.gmra.mxu0 %v222_v45 }
 0x26c   :  { %v309_v47 = vpop.f32.mrf.mxu0 }
 0x26d   :  { %v310_v48 = vadd.f32 %v334_v46, %v309_v47 }
 0x26e   :  { %v448_v49 = vpop.f32.mrf.mxu0 }
 0x26f   :  { %314 = vst.msk [vmem:[#allocation7] sm:$0xff] %vm313_vm2, %v310_v48 }
 0x270   :  { %507 = shalt.err (!%p504_p0)
}
 0x271   :  { %324 = dma.vmem_to_hbm [thread:$0]  %s322_s12, 128, %s712_s5, [#allocation4]  }
 0x272   :  { %520 = dma.done.wait [#allocation4], 128  }
 0x273   :  { %521 = vsyncadd [#allocation4], 4294967168 }
 0x274   :  { %328 = vsyncpa [#allocation3], 1 }
 0x275   :  { %329 = vsyncpa [#allocation6], 1 }
 0x276   :  { %330 = vsyncpa [#allocation4], 1 }

</bundles_post_ra>
